<compile_context>
chip_gen: v7x
topology: tpu7x:2x2x1
jax: 0.10.0
libtpu: 0.0.40
codegen_flags: <defaults>
</compile_context>

<pallas_src>
import jax
import jax.numpy as jnp
from jax.experimental import pallas as pl
from jax.experimental.pallas import tpu as pltpu

_LANE = 128
_MIB = 1024 * 1024


def _round_up(v: int, m: int) -> int:
    return ((v + m - 1) // m) * m


def _crelu_kernel(x_ref, o_ref):
    """Row-block kernel: out[:, :F] = relu(x), out[:, F:] = relu(-x)."""
    x = x_ref[...]
    feat = x.shape[-1]
    # Lane-dense unmasked stores whenever F % 128 == 0 (recommended hot path).
    o_ref[:, :feat] = jnp.maximum(x, 0).astype(o_ref.dtype)
    o_ref[:, feat:] = jnp.maximum(-x, 0).astype(o_ref.dtype)


def _crelu_kernel_colsplit(x_ref, o_ref):
    """Column-split kernel; output viewed as (rows, 2, F_block)."""
    x = x_ref[...]
    # Both halves start at lane offset 0 regardless of the feature offset.
    o_ref[:, 0, :] = jnp.maximum(x, 0).astype(o_ref.dtype)
    o_ref[:, 1, :] = jnp.maximum(-x, 0).astype(o_ref.dtype)


def _generation_budgets():
    """Generation-aware (vmem_limit_bytes, block_vmem_budget, target_input_bytes)."""
    try:
        phys = int(pltpu.get_tpu_info().vmem_capacity_bytes)
    except Exception:
        phys = 64 * _MIB  # conservative fallback (v7x per-core VMEM)
    # Leave headroom below physical VMEM for Mosaic internal scratch:
    # v7x (64 MiB) -> 48 MiB scoped limit; v5e/v6e (128 MiB) -> 64 MiB.
    vmem_limit = min((phys * 3) // 4, 64 * _MIB)
    # Purely HBM-bound: bigger steps amortize the ~0.35 us per-step overhead.
    # On fast-HBM / small-VMEM chips (v7x) push to ~6 MiB input per step.
    target_in = 6 * _MIB if phys <= 64 * _MIB else 4 * _MIB
    block_budget = max(4 * _MIB, vmem_limit - 8 * _MIB)
    return vmem_limit, block_budget, target_in


def crelu(x: jax.Array, *, row_tile: int | None = None,
          col_tile: int | None = None,
          force_column_split: bool = False) -> jax.Array:
    """CReLU(x) = relu(concat([x, -x], axis=-1)) for any (..., F) input."""
    *lead, feat = x.shape
    rows = 1
    for d in lead:
        rows *= d
    x2d = x.reshape(rows, feat)

    itemsize = jnp.dtype(x.dtype).itemsize
    # Sublane packing: one vreg holds 8 f32 rows, 16 bf16 rows, 32 int8 rows.
    sublane = max(8, 32 // max(1, itemsize))
    vmem_limit, block_budget, target_in = _generation_budgets()

    # Padded (VMEM-resident) bytes per row of the input / output blocks.
    # x2: double-buffered pipeline holds two copies of each block.
    in_row_bytes = _round_up(feat, _LANE) * itemsize
    out_row_bytes = _round_up(2 * feat, _LANE) * itemsize
    per_row_db = 2 * (in_row_bytes + out_row_bytes)

    cost = pl.CostEstimate(
        flops=3 * rows * feat,                        # negate + two maxima
        transcendentals=0,
        bytes_accessed=3 * rows * feat * itemsize,    # read F, write 2F per row
    )

    use_colsplit = force_column_split or (sublane * per_row_db > block_budget)

    if not use_colsplit:
        # ---- Primary path: 1-D row grid, whole feature dim per block. ----
        if row_tile is None:
            tile = min(target_in // in_row_bytes, block_budget // per_row_db)
            tile = max(sublane, (tile // sublane) * sublane)
        else:
            tile = max(sublane, _round_up(row_tile, sublane))
        if tile >= rows:
            # Single full block: block dim == array dim is always legal.
            tile = rows

        out2d = pl.pallas_call(
            _crelu_kernel,
            out_shape=jax.ShapeDtypeStruct((rows, 2 * feat), x.dtype),
            grid_spec=pltpu.PrefetchScalarGridSpec(
                num_scalar_prefetch=0,
                grid=(pl.cdiv(rows, tile),),
                in_specs=[pl.BlockSpec((tile, feat), lambda i: (i, 0))],
                out_specs=pl.BlockSpec((tile, 2 * feat), lambda i: (i, 0)),
            ),
            compiler_params=pltpu.CompilerParams(
                # TODO(synk): on v7x, switch this axis to pltpu.CORE_PARALLEL if
                # xprof shows the row grid streaming on a single TensorCore.
                dimension_semantics=("parallel",),
                vmem_limit_bytes=vmem_limit,
            ),
            cost_estimate=cost,
        )(x2d)
        return out2d.reshape(*lead, 2 * feat)

    # ---- Wide-feature fallback: split the feature dim as well. ----
    tile_r = rows if rows < sublane else sublane
    eff_r = max(tile_r, sublane)
    # Output block (tile_r, 2, tile_f) pads its size-2 dim up to one sublane
    # group -> ~(1 + sublane) * tile_r * tile_f live elements per buffer pair.
    per_col_db = 2 * (1 + sublane) * eff_r * itemsize
    if col_tile is None:
        tf = min(target_in // (eff_r * itemsize), block_budget // per_col_db)
        tf = max(_LANE, (tf // _LANE) * _LANE)
    else:
        tf = max(_LANE, _round_up(col_tile, _LANE))
    if tf >= feat:
        tf = feat

    out3d = pl.pallas_call(
        _crelu_kernel_colsplit,
        out_shape=jax.ShapeDtypeStruct((rows, 2, feat), x.dtype),
        grid_spec=pltpu.PrefetchScalarGridSpec(
            num_scalar_prefetch=0,
            grid=(pl.cdiv(rows, tile_r), pl.cdiv(feat, tf)),
            in_specs=[pl.BlockSpec((tile_r, tf), lambda i, j: (i, j))],
            out_specs=pl.BlockSpec((tile_r, 2, tf), lambda i, j: (i, 0, j)),
        ),
        compiler_params=pltpu.CompilerParams(
            dimension_semantics=("parallel", "parallel"),
            vmem_limit_bytes=vmem_limit,
        ),
        cost_estimate=cost,
    )(x2d)
    # (rows, 2, F) -> (rows, 2F) is a contiguous, free reshape and equals
    # concat([relu(x), relu(-x)], -1).
    return out3d.reshape(rows, 2 * feat).reshape(*lead, 2 * feat)


def _reference(x):
    return jnp.maximum(jnp.concatenate([x, -x], axis=-1), 0)


if __name__ == "__main__":
    key = jax.random.PRNGKey(0)
    k1, k2, k3 = jax.random.split(key, 3)

    # (batch=2, seq=8, hidden=32) -> output (2, 8, 64); single-block path.
    x = jax.random.normal(k1, (2, 8, 32), dtype=jnp.float32)
    out = crelu(x)
    jax.block_until_ready(out)
    assert out.shape == (2, 8, 64), out.shape
    assert jnp.allclose(out, _reference(x)), "mismatch vs reference (small)"

    # Ragged multi-block row path: rows=148 not divisible by tile=16.
    x2 = jax.random.normal(k2, (4, 37, 32), dtype=jnp.float32)
    out2 = crelu(x2, row_tile=16)
    jax.block_until_ready(out2)
    assert out2.shape == (4, 37, 64), out2.shape
    assert jnp.allclose(out2, _reference(x2)), "mismatch vs reference (ragged)"

    # Column-split fallback (forced at small shape): ragged rows AND ragged
    # feature blocks (F=160 with 128-wide column tiles).
    x3 = jax.random.normal(k3, (2, 7, 160), dtype=jnp.float32)
    out3 = crelu(x3, col_tile=128, force_column_split=True)
    jax.block_until_ready(out3)
    assert out3.shape == (2, 7, 320), out3.shape
    assert jnp.allclose(out3, _reference(x3)), "mismatch vs reference (colsplit)"

    print("KERNEL_OK")
</pallas_src>

<mosaic_0001>
module attributes {stable_mosaic.version = 11 : i64} {
  func.func @_crelu_kernel(%arg0: i32, %arg1: memref<16x32xf32, #tpu.memory_space<vmem>>, %arg2: memref<16x64xf32, #tpu.memory_space<vmem>>) attributes {dimension_semantics = [#tpu.dimension_semantics<parallel>], iteration_bounds = array<i64: 1>, scalar_prefetch = 0 : i64, scratch_operands = 0 : i64, tpu.core_type = #tpu.core_type<tc>, window_params = [{transform_indices = @transform_0, window_bounds = array<i64: 16, 32>}, {transform_indices = @transform_1, window_bounds = array<i64: 16, 64>}]} {
    %c0 = arith.constant 0 : index
    %c0_0 = arith.constant 0 : index
    %0 = vector.load %arg1[%c0, %c0_0] : memref<16x32xf32, #tpu.memory_space<vmem>>, vector<16x32xf32>
    %cst = arith.constant 0.000000e+00 : f32
    %1 = vector.broadcast %cst : f32 to vector<16x32xf32>
    %2 = arith.maximumf %0, %1 : vector<16x32xf32>
    %c0_1 = arith.constant 0 : index
    %c0_2 = arith.constant 0 : index
    %3 = vector.load %arg2[%c0_1, %c0_2] : memref<16x64xf32, #tpu.memory_space<vmem>>, vector<16x32xf32>
    tpu.vector_store %arg2[%c0_1, %c0_2], %2 {strides = array<i32>} : memref<16x64xf32, #tpu.memory_space<vmem>>, vector<16x32xf32>,
    %cst_3 = arith.constant 0.000000e+00 : f32
    %4 = vector.broadcast %cst_3 : f32 to vector<16x32xf32>
    %5 = arith.subf %4, %0 : vector<16x32xf32>
    %cst_4 = arith.constant 0.000000e+00 : f32
    %6 = vector.broadcast %cst_4 : f32 to vector<16x32xf32>
    %7 = arith.maximumf %5, %6 : vector<16x32xf32>
    %c0_5 = arith.constant 0 : index
    %c32 = arith.constant 32 : index
    %8 = vector.load %arg2[%c0_5, %c32] : memref<16x64xf32, #tpu.memory_space<vmem>>, vector<16x32xf32>
    tpu.vector_store %arg2[%c0_5, %c32], %7 {strides = array<i32>} : memref<16x64xf32, #tpu.memory_space<vmem>>, vector<16x32xf32>,
    return
  }
  func.func @transform_0(%arg0: i32) -> (i32, i32) {
    %c0_i32 = arith.constant 0 : i32
    %c0_i32_0 = arith.constant 0 : i32
    return %arg0, %c0_i32 : i32, i32
  }
  func.func @transform_1(%arg0: i32) -> (i32, i32) {
    %c0_i32 = arith.constant 0 : i32
    %c0_i32_0 = arith.constant 0 : i32
    return %arg0, %c0_i32 : i32, i32
  }
}

</mosaic_0001>

<bundles_post_ra>
// kernel: tpu_custom_call.1
= control target key start
LH: loop header
LB: loop body
LE: loop exit
PB: predicated region body
PF: predicated region fallthrough
CT: control target
= control target key end

     0   :  { %6 = vsyncpa [#allocation3], 0  ;;  %s160_s0 = inlined_call_operand.hbm [shape: f32[16,32], index: 0, kind: input, shape index: {}]   ;;  %s161_s1 = inlined_call_operand.hbm [shape: f32[16,64], index: 1, kind: output, shape index: {}]  }
   0x1   :  { %7 = vsyncpa [#allocation4], 0  ;;  %s115_s6 = smov [#allocation2]   ;;  %s67_s10 = scalar_lea.hbm %s160_s0, 256 }
   0x2   :  { %s13_s7 = sshll.u32 %s115_s6, 4  ;;  %p68_p0 = scmp.ne.s32.totalorder %s160_s0, %s67_s10  ;;  %s14_s7 = int_to_ptr.vmem [resolvable:$true] %s13_s7 }
   0x3   :  { %p71_p1 = scmp.lt.u32.totalorder %s67_s10, %s160_s0 }
   0x5   :  { %p73_p2 = pnand %p71_p1, %p68_p0 }
   0x7   :  { %76 = shalt.err (!%p73_p2)
}
   0x8   :  { %s77_s15 = scalar_lea.vmem %s14_s7, 256  ;;  %p82_p4 = scmp.lt.s32.totalorder %s14_s7, %s14_s7 }
   0x9   :  { %p78_p3 = scmp.ne.s32.totalorder %s14_s7, %s77_s15  ;;  %p83_p5 = scmp.lt.s32.totalorder %s77_s15, %s77_s15 }
   0xb   :  { %p84_p6 = por %p83_p5, %p82_p4 }
   0xd   :  { %p85_p7 = pnand %p84_p6, %p78_p3 }
   0xf   :  { %88 = shalt.err (!%p85_p7)
}
  0x10   :  { %s116_s16 = smov 128   ;;  %s117_s17 = smov 8  }
  0x11   :  { %19 = dma.hbm_to_vmem [thread:$0]  %s160_s0, 256, %s14_s7, [#allocation3], %s116_s16, %s116_s16, %s117_s17  }
  0x12   :  { %111 = dma.done.wait [#allocation3], 256  }
  0x13   :  { %112 = vsyncadd [#allocation3], 4294967040  ;;  %v23_v0 = vld [vmem:[#allocation2] sm:$0xff]  ;;  %v24_v1 = vld [vmem:[#allocation2 + $0x8] sm:$0xff]  ;;  %vm27_vm0 = vcmask 261120   ;;  %s118_s20 = smov 32  }
  0x14   :  { %v30_v2 = vsub.f32 0.0, %v23_v0  ;;  %v25_v3 = vmax.f32 %v23_v0, 0.0  ;;  %v26_v4 = vmax.f32 %v24_v1, 0.0  ;;  %v31_v5 = vsub.f32 0.0, %v24_v1  ;;  %s119_s21 = smov [#allocation5]  }
  0x15   :  { %vm42_vm1 = vcmask 523520   ;;  %s50_s0 = sshll.u32 %s119_s21, 4  ;;  %s51_s0 = int_to_ptr.vmem [resolvable:$true] %s50_s0 }
  0x16   :  { %v32_v6 = vmax.f32 %v30_v2, 0.0  ;;  %28 = vst.msk [vmem:[#allocation5] sm:$0xff] %vm27_vm0, %v25_v3  ;;  %29 = vst.msk [vmem:[#allocation5 + $0x8] sm:$0xff] %vm27_vm0, %v26_v4  ;;  %v33_v7 = vmax.f32 %v31_v5, 0.0  ;;  %s89_s22 = scalar_lea.vmem %s51_s0, 256  ;;  %p94_p9 = scmp.lt.s32.totalorder %s51_s0, %s51_s0 }
  0x17   :  { %p90_p8 = scmp.ne.s32.totalorder %s51_s0, %s89_s22  ;;  %p95_p10 = scmp.lt.s32.totalorder %s89_s22, %s89_s22 }
  0x18   :  { %36 = vrot.lane.b32.xlu0 %v32_v6, %s118_s20 }
  0x19   :  { %p96_p11 = por %p95_p10, %p94_p9 }
  0x1b   :  { %p97_p12 = pnand %p96_p11, %p90_p8 }
  0x1c   :  { %38 = vrot.lane.b32.xlu0 %v33_v7, %s118_s20 }
  0x8a   :  { %v37_v8 = vpop.permute.xlu0 %36 }
  0x8b   :  { %43 = vst.msk [vmem:[#allocation5] sm:$0xff] %vm42_vm1, %v37_v8 }
  0x8e   :  { %v39_v9 = vpop.permute.xlu0 %38 }
  0x8f   :  { %44 = vst.msk [vmem:[#allocation5 + $0x8] sm:$0xff] %vm42_vm1, %v39_v9 }
  0x90   :  { %100 = shalt.err (!%p97_p12)
}
  0x91   :  { %s101_s25 = scalar_lea.hbm %s161_s1, 256 }
  0x92   :  { %p102_p13 = scmp.ne.s32.totalorder %s161_s1, %s101_s25  ;;  %p105_p0 = scmp.lt.u32.totalorder %s101_s25, %s161_s1 }
  0x94   :  { %p107_p1 = pnand %p105_p0, %p102_p13 }
  0x96   :  { %110 = shalt.err (!%p107_p1)
}
  0x97   :  { %56 = dma.vmem_to_hbm [thread:$0]  %s51_s0, 256, %s161_s1, [#allocation4], %s116_s16, %s116_s16, %s117_s17  }
  0x98   :  { %113 = dma.done.wait [#allocation4], 256  }
  0x99   :  { %114 = vsyncadd [#allocation4], 4294967040 }
  0x9a   :  { %60 = vsyncpa [#allocation3], 1 }
  0x9b   :  { %61 = vsyncpa [#allocation4], 1 }

</bundles_post_ra>
